<compile_context>
chip_gen: v7x
topology: tpu7x:2x2x1
jax: 0.10.0
libtpu: 0.0.40
codegen_flags: <defaults>
</compile_context>

<pallas_src>
import functools

import jax
import jax.numpy as jnp
from jax.experimental import pallas as pl
from jax.experimental.pallas import tpu as pltpu


# ------------------------------- activation ---------------------------------
def _act(h, activator):
    if activator == "relu":
        return jnp.maximum(h, 0.0)
    elif activator == "tanh":
        return jnp.tanh(h)
    elif activator == "sigmoid":
        return jax.nn.sigmoid(h)
    elif activator == "lrelu":
        return jnp.where(h >= 0.0, h, 0.01 * h)
    # identity (matches PyTorch `else` branch)
    return h


def _l2_normalize_rows(h):
    # F.normalize(p=2, dim=1): x / max(||x||_2, 1e-12)
    sumsq = jnp.sum(h * h, axis=1, keepdims=True)
    inv = jax.lax.rsqrt(jnp.maximum(sumsq, 1e-24))   # == 1/max(||x||, 1e-12)
    return h * inv


# ----------------------- fused whole-forward kernel --------------------------
def _fused_gcn_kernel(*refs, n_layers, activator):
    # refs = [u_adj, i_adj, u_x, i_x,
    #         (uW_t, ub, iW_t, ib) * n_layers,
    #         u_out, i_out]
    u_adj_ref, i_adj_ref, u_x_ref, i_x_ref = refs[0:4]
    layer_refs = refs[4:4 + 4 * n_layers]
    u_out_ref, i_out_ref = refs[4 + 4 * n_layers:]

    def layer(adj_bf16, x, w_ref, b_ref):
        # Reassociated: adj @ (x @ W^T)  -- N x N contraction runs at width Dout.
        xw = jnp.dot(x.astype(jnp.bfloat16), w_ref[...],
                     preferred_element_type=jnp.float32)
        h = jnp.dot(adj_bf16, xw.astype(jnp.bfloat16),
                    preferred_element_type=jnp.float32)
        h = h + b_ref[...]                 # bias in f32
        h = _act(h, activator)
        # dropout: identity at inference
        return _l2_normalize_rows(h)       # f32

    u_adj = u_adj_ref[...]                 # bf16, resident for both layers
    i_adj = i_adj_ref[...]
    u = u_x_ref[...]
    i = i_x_ref[...]
    for li in range(n_layers):
        uw_ref, ub_ref, iw_ref, ib_ref = layer_refs[4 * li: 4 * li + 4]
        u = layer(u_adj, u, uw_ref, ub_ref)
        i = layer(i_adj, i, iw_ref, ib_ref)
    u_out_ref[...] = u.astype(u_out_ref.dtype)
    i_out_ref[...] = i.astype(i_out_ref.dtype)


def gcn_s_forward(params, user_adj, item_adj, activator="relu"):
    """Whole GCN_S forward (all layers, user + item paths) in ONE pallas_call.

    Single-block path: intended for graphs whose dense adjacency fits in VMEM
    (N up to ~1-2k). For larger graphs use gcn_layer_tiled per layer.
    """
    u_layers, i_layers = params["u_layers"], params["i_layers"]
    n_layers = len(u_layers)
    nu, ni = user_adj.shape[0], item_adj.shape[0]

    ua = user_adj.astype(jnp.bfloat16)
    ia = item_adj.astype(jnp.bfloat16)
    u0 = params["embedding_user"].astype(jnp.bfloat16)
    i0 = params["embedding_item"].astype(jnp.bfloat16)

    inputs = [ua, ia, u0, i0]
    in_specs = [pl.BlockSpec(t.shape, lambda i: (0, 0)) for t in inputs]

    flops, trans = 0, 0
    dout_f = u0.shape[1]
    for (uw, ub), (iw, ib) in zip(u_layers, i_layers):
        dout, din = uw.shape
        dout_f = dout
        uw_t = uw.T.astype(jnp.bfloat16)
        iw_t = iw.T.astype(jnp.bfloat16)
        ub2 = ub.reshape(1, dout).astype(jnp.float32)
        ib2 = ib.reshape(1, dout).astype(jnp.float32)
        layer_tensors = [uw_t, ub2, iw_t, ib2]
        inputs += layer_tensors
        in_specs += [pl.BlockSpec(t.shape, lambda i: (0, 0))
                     for t in layer_tensors]
        flops += 2 * nu * din * dout + 2 * nu * nu * dout
        flops += 2 * ni * din * dout + 2 * ni * ni * dout
        trans += (nu + ni)                              # rsqrt per row
        if activator in ("tanh", "sigmoid"):
            trans += (nu + ni) * dout

    out_shape = (jax.ShapeDtypeStruct((nu, dout_f), jnp.float32),
                 jax.ShapeDtypeStruct((ni, dout_f), jnp.float32))
    out_specs = (pl.BlockSpec((nu, dout_f), lambda i: (0, 0)),
                 pl.BlockSpec((ni, dout_f), lambda i: (0, 0)))

    bytes_accessed = sum(int(t.size) * t.dtype.itemsize for t in inputs)
    bytes_accessed += (nu + ni) * dout_f * 4

    kernel = functools.partial(_fused_gcn_kernel,
                               n_layers=n_layers, activator=activator)
    return pl.pallas_call(
        kernel,
        out_shape=out_shape,
        grid=(1,),
        in_specs=in_specs,
        out_specs=out_specs,
        compiler_params=pltpu.CompilerParams(
            dimension_semantics=("arbitrary",)),
        cost_estimate=pl.CostEstimate(flops=flops, transcendentals=trans,
                                      bytes_accessed=bytes_accessed),
    )(*inputs)


# ------------------- row-tiled single-layer kernel (big N) -------------------
def _gcn_layer_tiled_kernel(adj_ref, xw_ref, b_ref, o_ref, *, activator):
    # adj_ref: [TM, N] bf16 row tile; xw_ref: [N, Dout] bf16 (hoisted x @ W^T)
    h = jnp.dot(adj_ref[...], xw_ref[...], preferred_element_type=jnp.float32)
    h = h + b_ref[...]
    h = _act(h, activator)
    o_ref[...] = _l2_normalize_rows(h).astype(o_ref.dtype)


def gcn_layer_tiled(adj, x, w_t, b, activator="relu", tm=256):
    """One GCN_S layer, row-tiled + pipelined (scales past VMEM adjacency)."""
    n = adj.shape[0]
    dout = w_t.shape[1]
    # Hoisted, grid-invariant feature transform (reassociation).
    xw = jnp.dot(x.astype(jnp.bfloat16), w_t.astype(jnp.bfloat16),
                 preferred_element_type=jnp.float32).astype(jnp.bfloat16)
    adj_b = adj.astype(jnp.bfloat16)
    b2 = b.reshape(1, dout).astype(jnp.float32)

    tm = min(tm, n)
    if tm < n:
        tm = max(16, (tm // 16) * 16)     # bf16-friendly sublane multiple
    grid = (pl.cdiv(n, tm),)

    flops = 2 * n * n * dout
    bytes_accessed = (int(adj_b.size) * 2 + int(xw.size) * 2
                      + int(b2.size) * 4 + n * dout * 4)
    kernel = functools.partial(_gcn_layer_tiled_kernel, activator=activator)
    return pl.pallas_call(
        kernel,
        out_shape=jax.ShapeDtypeStruct((n, dout), jnp.float32),
        grid=grid,
        in_specs=[
            pl.BlockSpec((tm, n), lambda i: (i, 0)),      # adj row tile
            pl.BlockSpec((n, dout), lambda i: (0, 0)),    # xw resident
            pl.BlockSpec((1, dout), lambda i: (0, 0)),    # bias resident
        ],
        out_specs=pl.BlockSpec((tm, dout), lambda i: (i, 0)),
        compiler_params=pltpu.CompilerParams(
            dimension_semantics=("parallel",)),           # megacore on v7x
        cost_estimate=pl.CostEstimate(flops=flops, transcendentals=n,
                                      bytes_accessed=bytes_accessed),
    )(adj_b, xw, b2)


# ------------------------------ Model wrapper --------------------------------
def init_params(key, n_users, n_items, emb_dim, layer_dims):
    """Deterministic synthetic parameter init matching the PyTorch shapes."""
    dims = [emb_dim] + list(layer_dims)
    ks = jax.random.split(key, 4 + 4 * len(layer_dims))
    init_range = 0.1 * emb_dim ** (-0.5)
    params = {
        "embedding_user": jax.random.uniform(
            ks[0], (n_users, emb_dim), jnp.float32, -init_range, init_range),
        "embedding_item": jax.random.uniform(
            ks[1], (n_items, emb_dim), jnp.float32, -init_range, init_range),
        "u_layers": [],
        "i_layers": [],
    }
    ki = 2
    for li in range(len(layer_dims)):
        fan_in = dims[li]
        bound = 1.0 / (fan_in ** 0.5)
        for which in ("u_layers", "i_layers"):
            w = jax.random.uniform(
                ks[ki], (dims[li + 1], dims[li]), jnp.float32, -bound, bound)
            bvec = jax.random.uniform(
                ks[ki + 1], (dims[li + 1],), jnp.float32, -bound, bound)
            params[which].append((w, bvec))
            ki += 2
    return params


def make_norm_adj(key, n):
    """Dense synthetic 'normalized adjacency': random non-negative, row-normalized."""
    a = jax.random.uniform(key, (n, n), jnp.float32, 0.0, 1.0)
    a = a * (a > 0.7)
    a = a + jnp.eye(n, dtype=jnp.float32)
    return a / jnp.sum(a, axis=1, keepdims=True)


# ---------------------------------- main -------------------------------------
if __name__ == "__main__":
    n_users, n_items = 64, 48
    emb_dim = 32
    layer_dims = [32, 16]          # config['layers'] == "32-16"
    activator = "relu"

    key = jax.random.PRNGKey(0)
    k_params, k_uadj, k_iadj = jax.random.split(key, 3)

    params = init_params(k_params, n_users, n_items, emb_dim, layer_dims)
    user_adj = make_norm_adj(k_uadj, n_users)
    item_adj = make_norm_adj(k_iadj, n_items)

    # Fused, single-pallas_call forward.
    fwd = jax.jit(gcn_s_forward, static_argnames=("activator",))
    u_emb, i_emb = fwd(params, user_adj, item_adj, activator=activator)
    u_emb = jax.block_until_ready(u_emb)
    i_emb = jax.block_until_ready(i_emb)
    assert u_emb.shape == (n_users, layer_dims[-1])
    assert i_emb.shape == (n_items, layer_dims[-1])

    # Pure-JAX f32 reference matching the PyTorch forward.
    def ref_layer(adj, x, w, b):
        h = adj @ x
        h = h @ w.T + b
        h = jnp.maximum(h, 0.0)
        nrm = jnp.sqrt(jnp.sum(h * h, axis=1, keepdims=True))
        return h / jnp.maximum(nrm, 1e-12)

    ur, ir = params["embedding_user"], params["embedding_item"]
    for (uw, ub), (iw, ib) in zip(params["u_layers"], params["i_layers"]):
        ur = ref_layer(user_adj, ur, uw, ub)
        ir = ref_layer(item_adj, ir, iw, ib)

    # bf16 matmul inputs with f32 accumulation -> looser tolerance than pure f32.
    assert jnp.allclose(u_emb, ur, atol=3e-2), "fused user embeddings mismatch"
    assert jnp.allclose(i_emb, ir, atol=3e-2), "fused item embeddings mismatch"

    # Also exercise the row-tiled large-N path (small TM so the grid > 1).
    ut, it = params["embedding_user"], params["embedding_item"]
    for (uw, ub), (iw, ib) in zip(params["u_layers"], params["i_layers"]):
        ut = gcn_layer_tiled(user_adj, ut, uw.T, ub, activator, tm=32)
        it = gcn_layer_tiled(item_adj, it, iw.T, ib, activator, tm=32)
    ut = jax.block_until_ready(ut)
    it = jax.block_until_ready(it)
    assert jnp.allclose(ut, ur, atol=3e-2), "tiled user embeddings mismatch"
    assert jnp.allclose(it, ir, atol=3e-2), "tiled item embeddings mismatch"

    print("KERNEL_OK")
</pallas_src>

<mosaic_0001>
module attributes {stable_mosaic.version = 11 : i64} {
  func.func @_fused_gcn_kernel(%arg0: i32, %arg1: memref<64x64xbf16, #tpu.memory_space<vmem>>, %arg2: memref<48x48xbf16, #tpu.memory_space<vmem>>, %arg3: memref<64x32xbf16, #tpu.memory_space<vmem>>, %arg4: memref<48x32xbf16, #tpu.memory_space<vmem>>, %arg5: memref<32x32xbf16, #tpu.memory_space<vmem>>, %arg6: memref<1x32xf32, #tpu.memory_space<vmem>>, %arg7: memref<32x32xbf16, #tpu.memory_space<vmem>>, %arg8: memref<1x32xf32, #tpu.memory_space<vmem>>, %arg9: memref<32x16xbf16, #tpu.memory_space<vmem>>, %arg10: memref<1x16xf32, #tpu.memory_space<vmem>>, %arg11: memref<32x16xbf16, #tpu.memory_space<vmem>>, %arg12: memref<1x16xf32, #tpu.memory_space<vmem>>, %arg13: memref<64x16xf32, #tpu.memory_space<vmem>>, %arg14: memref<48x16xf32, #tpu.memory_space<vmem>>) attributes {dimension_semantics = [#tpu.dimension_semantics<arbitrary>], iteration_bounds = array<i64: 1>, scalar_prefetch = 0 : i64, scratch_operands = 0 : i64, tpu.core_type = #tpu.core_type<tc>, window_params = [{pipeline_mode = #tpu.pipeline_mode<synchronous>, transform_indices = @transform_0, window_bounds = array<i64: 64, 64>}, {pipeline_mode = #tpu.pipeline_mode<synchronous>, transform_indices = @transform_1, window_bounds = array<i64: 48, 48>}, {pipeline_mode = #tpu.pipeline_mode<synchronous>, transform_indices = @transform_2, window_bounds = array<i64: 64, 32>}, {pipeline_mode = #tpu.pipeline_mode<synchronous>, transform_indices = @transform_3, window_bounds = array<i64: 48, 32>}, {pipeline_mode = #tpu.pipeline_mode<synchronous>, transform_indices = @transform_4, window_bounds = array<i64: 32, 32>}, {pipeline_mode = #tpu.pipeline_mode<synchronous>, transform_indices = @transform_5, window_bounds = array<i64: 1, 32>}, {pipeline_mode = #tpu.pipeline_mode<synchronous>, transform_indices = @transform_6, window_bounds = array<i64: 32, 32>}, {pipeline_mode = #tpu.pipeline_mode<synchronous>, transform_indices = @transform_7, window_bounds = array<i64: 1, 32>}, {pipeline_mode = #tpu.pipeline_mode<synchronous>, transform_indices = @transform_8, window_bounds = array<i64: 32, 16>}, {pipeline_mode = #tpu.pipeline_mode<synchronous>, transform_indices = @transform_9, window_bounds = array<i64: 1, 16>}, {pipeline_mode = #tpu.pipeline_mode<synchronous>, transform_indices = @transform_10, window_bounds = array<i64: 32, 16>}, {pipeline_mode = #tpu.pipeline_mode<synchronous>, transform_indices = @transform_11, window_bounds = array<i64: 1, 16>}, {pipeline_mode = #tpu.pipeline_mode<synchronous>, transform_indices = @transform_12, window_bounds = array<i64: 64, 16>}, {pipeline_mode = #tpu.pipeline_mode<synchronous>, transform_indices = @transform_13, window_bounds = array<i64: 48, 16>}]} {
    %c0 = arith.constant 0 : index
    %c0_0 = arith.constant 0 : index
    %0 = vector.load %arg1[%c0, %c0_0] : memref<64x64xbf16, #tpu.memory_space<vmem>>, vector<64x64xbf16>
    %c0_1 = arith.constant 0 : index
    %c0_2 = arith.constant 0 : index
    %1 = vector.load %arg2[%c0_1, %c0_2] : memref<48x48xbf16, #tpu.memory_space<vmem>>, vector<48x48xbf16>
    %c0_3 = arith.constant 0 : index
    %c0_4 = arith.constant 0 : index
    %2 = vector.load %arg3[%c0_3, %c0_4] : memref<64x32xbf16, #tpu.memory_space<vmem>>, vector<64x32xbf16>
    %c0_5 = arith.constant 0 : index
    %c0_6 = arith.constant 0 : index
    %3 = vector.load %arg4[%c0_5, %c0_6] : memref<48x32xbf16, #tpu.memory_space<vmem>>, vector<48x32xbf16>
    %c0_7 = arith.constant 0 : index
    %c0_8 = arith.constant 0 : index
    %4 = vector.load %arg5[%c0_7, %c0_8] : memref<32x32xbf16, #tpu.memory_space<vmem>>, vector<32x32xbf16>
    %cst = arith.constant dense<0.000000e+00> : vector<64x32xf32>
    %5 = tpu.matmul %2, %4, %cst {dimension_numbers = #tpu.dot_dimension_numbers<[1], [0], [0], [1], [0, 0, 1, 1], [], []>} : vector<64x32xbf16>, vector<32x32xbf16>, vector<64x32xf32> -> vector<64x32xf32>
    %6 = arith.truncf %5 : vector<64x32xf32> to vector<64x32xbf16>
    %cst_9 = arith.constant dense<0.000000e+00> : vector<64x32xf32>
    %7 = tpu.matmul %0, %6, %cst_9 {dimension_numbers = #tpu.dot_dimension_numbers<[1], [0], [0], [1], [0, 0, 1, 1], [], []>} : vector<64x64xbf16>, vector<64x32xbf16>, vector<64x32xf32> -> vector<64x32xf32>
    %c0_10 = arith.constant 0 : index
    %c0_11 = arith.constant 0 : index
    %8 = vector.load %arg6[%c0_10, %c0_11] : memref<1x32xf32, #tpu.memory_space<vmem>>, vector<1x32xf32>
    %9 = vector.broadcast %8 : vector<1x32xf32> to vector<64x32xf32>
    %10 = arith.addf %7, %9 : vector<64x32xf32>
    %cst_12 = arith.constant 0.000000e+00 : f32
    %11 = vector.broadcast %cst_12 : f32 to vector<64x32xf32>
    %12 = arith.maximumf %10, %11 : vector<64x32xf32>
    %13 = arith.mulf %12, %12 : vector<64x32xf32>
    %cst_13 = arith.constant dense<0.000000e+00> : vector<64xf32>
    %14 = vector.multi_reduction <add>, %13, %cst_13 [1] : vector<64x32xf32> to vector<64xf32>
    %15 = vector.shape_cast %14 : vector<64xf32> to vector<64x1xf32>
    %cst_14 = arith.constant 1.000000e-24 : f32
    %16 = vector.broadcast %cst_14 : f32 to vector<64x1xf32>
    %17 = arith.maximumf %15, %16 : vector<64x1xf32>
    %18 = math.rsqrt %17 : vector<64x1xf32>
    %19 = vector.broadcast %18 : vector<64x1xf32> to vector<64x32xf32>
    %20 = arith.mulf %12, %19 : vector<64x32xf32>
    %c0_15 = arith.constant 0 : index
    %c0_16 = arith.constant 0 : index
    %21 = vector.load %arg7[%c0_15, %c0_16] : memref<32x32xbf16, #tpu.memory_space<vmem>>, vector<32x32xbf16>
    %cst_17 = arith.constant dense<0.000000e+00> : vector<48x32xf32>
    %22 = tpu.matmul %3, %21, %cst_17 {dimension_numbers = #tpu.dot_dimension_numbers<[1], [0], [0], [1], [0, 0, 1, 1], [], []>} : vector<48x32xbf16>, vector<32x32xbf16>, vector<48x32xf32> -> vector<48x32xf32>
    %23 = arith.truncf %22 : vector<48x32xf32> to vector<48x32xbf16>
    %cst_18 = arith.constant dense<0.000000e+00> : vector<48x32xf32>
    %24 = tpu.matmul %1, %23, %cst_18 {dimension_numbers = #tpu.dot_dimension_numbers<[1], [0], [0], [1], [0, 0, 1, 1], [], []>} : vector<48x48xbf16>, vector<48x32xbf16>, vector<48x32xf32> -> vector<48x32xf32>
    %c0_19 = arith.constant 0 : index
    %c0_20 = arith.constant 0 : index
    %25 = vector.load %arg8[%c0_19, %c0_20] : memref<1x32xf32, #tpu.memory_space<vmem>>, vector<1x32xf32>
    %26 = vector.broadcast %25 : vector<1x32xf32> to vector<48x32xf32>
    %27 = arith.addf %24, %26 : vector<48x32xf32>
    %cst_21 = arith.constant 0.000000e+00 : f32
    %28 = vector.broadcast %cst_21 : f32 to vector<48x32xf32>
    %29 = arith.maximumf %27, %28 : vector<48x32xf32>
    %30 = arith.mulf %29, %29 : vector<48x32xf32>
    %cst_22 = arith.constant dense<0.000000e+00> : vector<48xf32>
    %31 = vector.multi_reduction <add>, %30, %cst_22 [1] : vector<48x32xf32> to vector<48xf32>
    %32 = vector.shape_cast %31 : vector<48xf32> to vector<48x1xf32>
    %cst_23 = arith.constant 1.000000e-24 : f32
    %33 = vector.broadcast %cst_23 : f32 to vector<48x1xf32>
    %34 = arith.maximumf %32, %33 : vector<48x1xf32>
    %35 = math.rsqrt %34 : vector<48x1xf32>
    %36 = vector.broadcast %35 : vector<48x1xf32> to vector<48x32xf32>
    %37 = arith.mulf %29, %36 : vector<48x32xf32>
    %38 = arith.truncf %20 : vector<64x32xf32> to vector<64x32xbf16>
    %c0_24 = arith.constant 0 : index
    %c0_25 = arith.constant 0 : index
    %39 = vector.load %arg9[%c0_24, %c0_25] : memref<32x16xbf16, #tpu.memory_space<vmem>>, vector<32x16xbf16>
    %cst_26 = arith.constant dense<0.000000e+00> : vector<64x16xf32>
    %40 = tpu.matmul %38, %39, %cst_26 {dimension_numbers = #tpu.dot_dimension_numbers<[1], [0], [0], [1], [0, 0, 1, 1], [], []>} : vector<64x32xbf16>, vector<32x16xbf16>, vector<64x16xf32> -> vector<64x16xf32>
    %41 = arith.truncf %40 : vector<64x16xf32> to vector<64x16xbf16>
    %cst_27 = arith.constant dense<0.000000e+00> : vector<64x16xf32>
    %42 = tpu.matmul %0, %41, %cst_27 {dimension_numbers = #tpu.dot_dimension_numbers<[1], [0], [0], [1], [0, 0, 1, 1], [], []>} : vector<64x64xbf16>, vector<64x16xbf16>, vector<64x16xf32> -> vector<64x16xf32>
    %c0_28 = arith.constant 0 : index
    %c0_29 = arith.constant 0 : index
    %43 = vector.load %arg10[%c0_28, %c0_29] : memref<1x16xf32, #tpu.memory_space<vmem>>, vector<1x16xf32>
    %44 = vector.broadcast %43 : vector<1x16xf32> to vector<64x16xf32>
    %45 = arith.addf %42, %44 : vector<64x16xf32>
    %cst_30 = arith.constant 0.000000e+00 : f32
    %46 = vector.broadcast %cst_30 : f32 to vector<64x16xf32>
    %47 = arith.maximumf %45, %46 : vector<64x16xf32>
    %48 = arith.mulf %47, %47 : vector<64x16xf32>
    %cst_31 = arith.constant dense<0.000000e+00> : vector<64xf32>
    %49 = vector.multi_reduction <add>, %48, %cst_31 [1] : vector<64x16xf32> to vector<64xf32>
    %50 = vector.shape_cast %49 : vector<64xf32> to vector<64x1xf32>
    %cst_32 = arith.constant 1.000000e-24 : f32
    %51 = vector.broadcast %cst_32 : f32 to vector<64x1xf32>
    %52 = arith.maximumf %50, %51 : vector<64x1xf32>
    %53 = math.rsqrt %52 : vector<64x1xf32>
    %54 = vector.broadcast %53 : vector<64x1xf32> to vector<64x16xf32>
    %55 = arith.mulf %47, %54 : vector<64x16xf32>
    %56 = arith.truncf %37 : vector<48x32xf32> to vector<48x32xbf16>
    %c0_33 = arith.constant 0 : index
    %c0_34 = arith.constant 0 : index
    %57 = vector.load %arg11[%c0_33, %c0_34] : memref<32x16xbf16, #tpu.memory_space<vmem>>, vector<32x16xbf16>
    %cst_35 = arith.constant dense<0.000000e+00> : vector<48x16xf32>
    %58 = tpu.matmul %56, %57, %cst_35 {dimension_numbers = #tpu.dot_dimension_numbers<[1], [0], [0], [1], [0, 0, 1, 1], [], []>} : vector<48x32xbf16>, vector<32x16xbf16>, vector<48x16xf32> -> vector<48x16xf32>
    %59 = arith.truncf %58 : vector<48x16xf32> to vector<48x16xbf16>
    %cst_36 = arith.constant dense<0.000000e+00> : vector<48x16xf32>
    %60 = tpu.matmul %1, %59, %cst_36 {dimension_numbers = #tpu.dot_dimension_numbers<[1], [0], [0], [1], [0, 0, 1, 1], [], []>} : vector<48x48xbf16>, vector<48x16xbf16>, vector<48x16xf32> -> vector<48x16xf32>
    %c0_37 = arith.constant 0 : index
    %c0_38 = arith.constant 0 : index
    %61 = vector.load %arg12[%c0_37, %c0_38] : memref<1x16xf32, #tpu.memory_space<vmem>>, vector<1x16xf32>
    %62 = vector.broadcast %61 : vector<1x16xf32> to vector<48x16xf32>
    %63 = arith.addf %60, %62 : vector<48x16xf32>
    %cst_39 = arith.constant 0.000000e+00 : f32
    %64 = vector.broadcast %cst_39 : f32 to vector<48x16xf32>
    %65 = arith.maximumf %63, %64 : vector<48x16xf32>
    %66 = arith.mulf %65, %65 : vector<48x16xf32>
    %cst_40 = arith.constant dense<0.000000e+00> : vector<48xf32>
    %67 = vector.multi_reduction <add>, %66, %cst_40 [1] : vector<48x16xf32> to vector<48xf32>
    %68 = vector.shape_cast %67 : vector<48xf32> to vector<48x1xf32>
    %cst_41 = arith.constant 1.000000e-24 : f32
    %69 = vector.broadcast %cst_41 : f32 to vector<48x1xf32>
    %70 = arith.maximumf %68, %69 : vector<48x1xf32>
    %71 = math.rsqrt %70 : vector<48x1xf32>
    %72 = vector.broadcast %71 : vector<48x1xf32> to vector<48x16xf32>
    %73 = arith.mulf %65, %72 : vector<48x16xf32>
    %c0_42 = arith.constant 0 : index
    %c0_43 = arith.constant 0 : index
    %74 = vector.load %arg13[%c0_42, %c0_43] : memref<64x16xf32, #tpu.memory_space<vmem>>, vector<64x16xf32>
    tpu.vector_store %arg13[%c0_42, %c0_43], %55 {strides = array<i32>} : memref<64x16xf32, #tpu.memory_space<vmem>>, vector<64x16xf32>,
    %c0_44 = arith.constant 0 : index
    %c0_45 = arith.constant 0 : index
    %75 = vector.load %arg14[%c0_44, %c0_45] : memref<48x16xf32, #tpu.memory_space<vmem>>, vector<48x16xf32>
    tpu.vector_store %arg14[%c0_44, %c0_45], %73 {strides = array<i32>} : memref<48x16xf32, #tpu.memory_space<vmem>>, vector<48x16xf32>,
    return
  }
  func.func @transform_0(%arg0: i32) -> (i32, i32) {
    %c0_i32 = arith.constant 0 : i32
    %c0_i32_0 = arith.constant 0 : i32
    %c0_i32_1 = arith.constant 0 : i32
    return %c0_i32, %c0_i32_0 : i32, i32
  }
  func.func @transform_1(%arg0: i32) -> (i32, i32) {
    %c0_i32 = arith.constant 0 : i32
    %c0_i32_0 = arith.constant 0 : i32
    %c0_i32_1 = arith.constant 0 : i32
    return %c0_i32, %c0_i32_0 : i32, i32
  }
  func.func @transform_2(%arg0: i32) -> (i32, i32) {
    %c0_i32 = arith.constant 0 : i32
    %c0_i32_0 = arith.constant 0 : i32
    %c0_i32_1 = arith.constant 0 : i32
    return %c0_i32, %c0_i32_0 : i32, i32
  }
  func.func @transform_3(%arg0: i32) -> (i32, i32) {
    %c0_i32 = arith.constant 0 : i32
    %c0_i32_0 = arith.constant 0 : i32
    %c0_i32_1 = arith.constant 0 : i32
    return %c0_i32, %c0_i32_0 : i32, i32
  }
  func.func @transform_4(%arg0: i32) -> (i32, i32) {
    %c0_i32 = arith.constant 0 : i32
    %c0_i32_0 = arith.constant 0 : i32
    %c0_i32_1 = arith.constant 0 : i32
    return %c0_i32, %c0_i32_0 : i32, i32
  }
  func.func @transform_5(%arg0: i32) -> (i32, i32) {
    %c0_i32 = arith.constant 0 : i32
    %c0_i32_0 = arith.constant 0 : i32
    %c0_i32_1 = arith.constant 0 : i32
    return %c0_i32, %c0_i32_0 : i32, i32
  }
  func.func @transform_6(%arg0: i32) -> (i32, i32) {
    %c0_i32 = arith.constant 0 : i32
    %c0_i32_0 = arith.constant 0 : i32
    %c0_i32_1 = arith.constant 0 : i32
    return %c0_i32, %c0_i32_0 : i32, i32
  }
  func.func @transform_7(%arg0: i32) -> (i32, i32) {
    %c0_i32 = arith.constant 0 : i32
    %c0_i32_0 = arith.constant 0 : i32
    %c0_i32_1 = arith.constant 0 : i32
    return %c0_i32, %c0_i32_0 : i32, i32
  }
  func.func @transform_8(%arg0: i32) -> (i32, i32) {
    %c0_i32 = arith.constant 0 : i32
    %c0_i32_0 = arith.constant 0 : i32
    %c0_i32_1 = arith.constant 0 : i32
    return %c0_i32, %c0_i32_0 : i32, i32
  }
  func.func @transform_9(%arg0: i32) -> (i32, i32) {
    %c0_i32 = arith.constant 0 : i32
    %c0_i32_0 = arith.constant 0 : i32
    %c0_i32_1 = arith.constant 0 : i32
    return %c0_i32, %c0_i32_0 : i32, i32
  }
  func.func @transform_10(%arg0: i32) -> (i32, i32) {
    %c0_i32 = arith.constant 0 : i32
    %c0_i32_0 = arith.constant 0 : i32
    %c0_i32_1 = arith.constant 0 : i32
    return %c0_i32, %c0_i32_0 : i32, i32
  }
  func.func @transform_11(%arg0: i32) -> (i32, i32) {
    %c0_i32 = arith.constant 0 : i32
    %c0_i32_0 = arith.constant 0 : i32
    %c0_i32_1 = arith.constant 0 : i32
    return %c0_i32, %c0_i32_0 : i32, i32
  }
  func.func @transform_12(%arg0: i32) -> (i32, i32) {
    %c0_i32 = arith.constant 0 : i32
    %c0_i32_0 = arith.constant 0 : i32
    %c0_i32_1 = arith.constant 0 : i32
    return %c0_i32, %c0_i32_0 : i32, i32
  }
  func.func @transform_13(%arg0: i32) -> (i32, i32) {
    %c0_i32 = arith.constant 0 : i32
    %c0_i32_0 = arith.constant 0 : i32
    %c0_i32_1 = arith.constant 0 : i32
    return %c0_i32, %c0_i32_0 : i32, i32
  }
}

</mosaic_0001>

<bundles_post_ra>
// kernel: gcn_s_forward.1
= control target key start
LH: loop header
LB: loop body
LE: loop exit
PB: predicated region body
PF: predicated region fallthrough
CT: control target
= control target key end

     0   :  { %vm108_vm0 = vcmask 261120   ;;  %v1364_v6 = vmov 0.0   ;;  %vm1365_vm1 = vmmov 0   ;;  %vm217_vm2 = vcmask 523264   ;;  %s1824_s4 = inlined_call_operand.vmem [shape: bf16[32,32], index: 4, kind: input, shape index: {}]   ;;  %s1825_s2 = inlined_call_operand.vmem [shape: bf16[64,32], index: 2, kind: input, shape index: {}]   ;;  %s1826_s6 = inlined_call_operand.vmem [shape: bf16[32,32], index: 6, kind: input, shape index: {}]   ;;  %s1827_s3 = inlined_call_operand.vmem [shape: bf16[48,32], index: 3, kind: input, shape index: {}]   ;;  %s1828_s0 = inlined_call_operand.vmem [shape: bf16[64,64], index: 0, kind: input, shape index: {}]   ;;  %s1829_s1 = inlined_call_operand.vmem [shape: bf16[48,48], index: 1, kind: input, shape index: {}]   ;;  %s1830_s5 = inlined_call_operand.vmem [shape: f32[1,32], index: 5, kind: input, shape index: {}]   ;;  %s1831_s7 = inlined_call_operand.vmem [shape: f32[1,32], index: 7, kind: input, shape index: {}]   ;;  %s1832_s8 = inlined_call_operand.vmem [shape: bf16[32,16], index: 8, kind: input, shape index: {}]   ;;  %s1833_s10 = inlined_call_operand.vmem [shape: bf16[32,16], index: 10, kind: input, shape index: {}]   ;;  %s1834_s9 = inlined_call_operand.vmem [shape: f32[1,16], index: 9, kind: input, shape index: {}]   ;;  %s1835_s11 = inlined_call_operand.vmem [shape: f32[1,16], index: 11, kind: input, shape index: {}]   ;;  %s1836_s12 = inlined_call_operand.vmem [shape: f32[64,16], index: 12, kind: output, shape index: {0}]   ;;  %s1837_s13 = inlined_call_operand.vmem [shape: f32[48,16], index: 13, kind: output, shape index: {1}]  }
   0x1   :  { %v1286_v0 = vld [vmem:[%s1824_s4] sm:$0xff]   ;;  %v1287_v1 = vld [vmem:[%s1824_s4 + $0x8] sm:$0xff]   ;;  %v1290_v4 = vld [vmem:[%s1825_s2 + $0x10] sm:$0xff]   ;;  %vm481_vm3 = vcmask 392192   ;;  %vm785_vm4 = vcmask 130048  }
   0x2   :  { %1160 = vmatprep.subr.bf16.mxu0 %v1286_v0  ;;  %v1288_v2 = vld [vmem:[%s1825_s2] sm:$0xff]   ;;  %v1289_v3 = vld [vmem:[%s1825_s2 + $0x8] sm:$0xff]   ;;  %v1291_v8 = vld [vmem:[%s1825_s2 + $0x18] sm:$0xff]  }
   0x3   :  { %1161 = vmatpush3.bf16.msra.mxu0 %v1286_v0  ;;  %1164 = vmatprep.mubr.msk.bf16.mxu0 %vm108_vm0, %v1288_v2  ;;  %v1292_v5 = vld [vmem:[%s1826_s6] sm:$0xff]   ;;  %v1293_v7 = vld [vmem:[%s1826_s6 + $0x8] sm:$0xff]   ;;  %v1296_v11 = vld [vmem:[%s1827_s3 + $0x10] sm:$0xff]  }
   0x4   :  { %1162 = vmatprep.subr.bf16.mxu0 %v1287_v1  ;;  %v1294_v9 = vld [vmem:[%s1827_s3] sm:$0xff]   ;;  %v1295_v10 = vld [vmem:[%s1827_s3 + $0x8] sm:$0xff]   ;;  %v1496_v31 = vld [vmem:[%s1828_s0 + $0x10] sm:$0xff]  }
   0x5   :  { %v1297_v12 = vld [vmem:[%s1828_s0] sm:$0xff]   ;;  %v1491_v27 = vld [vmem:[%s1828_s0 + $0x8] sm:$0xff]   ;;  %v1507_v34 = vld [vmem:[%s1828_s0 + $0x18] sm:$0xff]  }
   0x6   :  { %1180 = vmatprep.mubr.msk.bf16.mxu1 %vm217_vm2, %v1297_v12  ;;  %v1517_v43 = vld [vmem:[%s1829_s1] sm:$0xff]   ;;  %v1526_v44 = vld [vmem:[%s1829_s1 + $0x8] sm:$0xff]   ;;  %v1535_v45 = vld [vmem:[%s1829_s1 + $0x10] sm:$0xff]  }
   0x7   :  { %1163 = vmatpush3.bf16.msra.mxu0 %v1287_v1  ;;  %v1066_v46 = vld [vmem:[%s1830_s5] ss:$0 sm:$0xff] }
   0x8   :  { %1188 = vmatprep.subr.bf16.mxu0 %v1364_v6 }
   0xa   :  { %1165 = vmatmul.mubr.msk.bf16.vlgmr.msra.gmra.mrb[0].mxu0 %vm108_vm0, %v1289_v3 }
   0xb   :  { %1168 = vmatprep.mubr.msk.bf16.mxu0 %vm108_vm0, %v1290_v4  ;;  %1189 = vmatpush3.bf16.msra.mxu0 %v1292_v5 }
   0xc   :  { %1190 = vmatprep.subr.bf16.mxu0 %v1364_v6 }
   0xf   :  { %1191 = vmatpush3.bf16.msra.mxu0 %v1293_v7 }
  0x12   :  { %1169 = vmatmul.mubr.msk.bf16.gmra.mrb[4].mxu0 %vm108_vm0, %v1291_v8 }
  0x13   :  { %1192 = vmatprep.mubr.msk.bf16.mxu0 %vm1365_vm1, %v1364_v6 }
  0x1a   :  { %1193 = vmatmul.mubr.msk.bf16.vlgmr.msra.gmra.mrb[8].mxu0 %vm108_vm0, %v1294_v9 }
  0x1b   :  { %1196 = vmatprep.mubr.msk.bf16.mxu0 %vm1365_vm1, %v1364_v6 }
  0x22   :  { %1197 = vmatmul.mubr.msk.bf16.gmra.mrb[12].mxu0 %vm108_vm0, %v1295_v10 }
  0x23   :  { %1200 = vmatprep.mubr.msk.bf16.mxu0 %vm1365_vm1, %v1364_v6 }
  0x2a   :  { %1201 = vmatmul.mubr.msk.bf16.gmra.mrb[16].mxu0 %vm108_vm0, %v1296_v11 }
  0xdd   :  { %v1166_v13 = vpop.f32.mrb[0].mxu0 }
  0xde   :  { %v155_v14 = vpop.f32.mrb[1].mxu0 }
  0xdf   :  { %v1167_v15 = vpop.f32.mrb[2].mxu0 }
  0xe0   :  { %v187_v16 = vpack.c.bf16 %v1167_v15, %v1166_v13  ;;  %v158_v17 = vpop.f32.mrb[3].mxu0 }
  0xe1   :  { %v186_v18 = vpack.c.bf16 %v158_v17, %v155_v14 }
  0xe3   :  { %1172 = vmatprep.subr.bf16.mxu1 %v186_v18 }
  0xe4   :  { %1173 = vmatpush3.bf16.msra.mxu1 %v186_v18  ;;  %v1083_v18 = vld [vmem:[%s1831_s7] ss:$0 sm:$0xff] }
  0xe5   :  { %v1170_v19 = vpop.f32.mrb[4].mxu0  ;;  %1174 = vmatprep.subr.bf16.mxu1 %v187_v16 }
  0xe6   :  { %v171_v20 = vpop.f32.mrb[5].mxu0 }
  0xe7   :  { %v1171_v21 = vpop.f32.mrb[6].mxu0 }
  0xe8   :  { %v189_v22 = vpack.c.bf16 %v1171_v21, %v1170_v19  ;;  %v174_v23 = vpop.f32.mrb[7].mxu0  ;;  %1175 = vmatpush3.bf16.msra.mxu1 %v187_v16 }
  0xe9   :  { %v188_v24 = vpack.c.bf16 %v174_v23, %v171_v20 }
  0xeb   :  { %1176 = vmatprep.subr.bf16.mxu1 %v188_v24 }
  0xec   :  { %1177 = vmatpush3.bf16.msra.mxu1 %v188_v24 }
  0xed   :  { %1178 = vmatprep.subr.bf16.mxu1 %v189_v22  ;;  %v433_v25 = vpop.f32.mrb[8].mxu0 }
  0xee   :  { %v1194_v26 = vpop.f32.mrb[9].mxu0 }
  0xef   :  { %v436_v28 = vpop.f32.mrb[10].mxu0 }
  0xf0   :  { %1179 = vmatpush3.bf16.msra.mxu1 %v189_v22  ;;  %v456_v29 = vpack.c.bf16 %v436_v28, %v433_v25  ;;  %v1195_v30 = vpop.f32.mrb[11].mxu0 }
  0xf1   :  { %1204 = vmatprep.subr.bf16.mxu1 %v1364_v6 }
  0xf3   :  { %1181 = vmatmul.mubr.msk.bf16.vlgmr.msra.gmra.mrb[0].mxu1 %vm217_vm2, %v1491_v27 }
  0xf4   :  { %1205 = vmatpush3.bf16.msra.mxu1 %v456_v29  ;;  %1184 = vmatprep.mubr.msk.bf16.mxu1 %vm217_vm2, %v1496_v31 }
  0xf5   :  { %v441_v32 = vpop.f32.mrb[12].mxu0  ;;  %1206 = vmatprep.subr.bf16.mxu1 %v1364_v6 }
  0xf6   :  { %v1198_v33 = vpop.f32.mrb[13].mxu0 }
  0xf7   :  { %v444_v35 = vpop.f32.mrb[14].mxu0 }
  0xf8   :  { %v457_v36 = vpack.c.bf16 %v444_v35, %v441_v32  ;;  %v1199_v37 = vpop.f32.mrb[15].mxu0 }
  0xfa   :  { %1207 = vmatpush3.bf16.msra.mxu1 %v457_v36 }
  0xfb   :  { %1185 = vmatmul.mubr.msk.bf16.gmra.mrb[4].mxu1 %vm217_vm2, %v1507_v34  ;;  %1208 = vmatprep.subr.bf16.mxu1 %v1364_v6 }
  0xfc   :  { %1210 = vmatprep.mubr.msk.bf16.mxu1 %vm1365_vm1, %v1364_v6 }
  0xfd   :  { %v449_v38 = vpop.f32.mrb[16].mxu0 }
  0xfe   :  { %v1202_v39 = vpop.f32.mrb[17].mxu0 }
  0xff   :  { %v452_v40 = vpop.f32.mrb[18].mxu0 }
 0x100   :  { %v458_v41 = vpack.c.bf16 %v452_v40, %v449_v38  ;;  %v1203_v42 = vpop.f32.mrb[19].mxu0 }
 0x102   :  { %1209 = vmatpush3.bf16.msra.mxu1 %v458_v41 }
 0x105   :  { %1211 = vmatmul.mubr.msk.bf16.vlgmr.msra.gmra.mrb[8].mxu1 %vm481_vm3, %v1517_v43 }
 0x106   :  { %1214 = vmatprep.mubr.msk.bf16.mxu1 %vm1365_vm1, %v1364_v6 }
 0x10d   :  { %1215 = vmatmul.mubr.msk.bf16.gmra.mrb[12].mxu1 %vm481_vm3, %v1526_v44 }
 0x10e   :  { %1218 = vmatprep.mubr.msk.bf16.mxu1 %vm1365_vm1, %v1364_v6 }
 0x115   :  { %1219 = vmatmul.mubr.msk.bf16.gmra.mrb[16].mxu1 %vm481_vm3, %v1535_v45 }
 0x116   :  { %1242 = vmatprep.mubr.msk.bf16.mxu1 %vm217_vm2, %v1297_v12 }
 0x1c6   :  { %v1182_v47 = vpop.f32.mrb[0].mxu1 }
 0x1c7   :  { %v273_v48 = vadd.f32 %v1182_v47, %v1066_v46  ;;  %v264_v49 = vpop.f32.mrb[1].mxu1 }
 0x1c8   :  { %v265_v50 = vadd.f32 %v1066_v46, %v264_v49  ;;  %v1183_v51 = vpop.f32.mrb[2].mxu1 }
 0x1c9   :  { %v1543_v52 = vmax.f32 %v273_v48, 0.0  ;;  %v276_v53 = vadd.f32 %v1183_v51, %v1066_v46  ;;  %v267_v54 = vpop.f32.mrb[3].mxu1 }
 0x1ca   :  { %v1545_v55 = vmax.f32 %v265_v50, 0.0  ;;  %v268_v56 = vadd.f32 %v1066_v46, %v267_v54 }
 0x1cb   :  { %v1547_v57 = vmax.f32 %v276_v53, 0.0  ;;  %v305_v58 = vmul.f32 %v1543_v52, %v1543_v52 }
 0x1cc   :  { %v1551_v59 = vmax.f32 %v268_v56, 0.0  ;;  %v303_v60 = vmul.f32 %v1545_v55, %v1545_v55 }
 0x1cd   :  { %v317_v61 = vsel %vm108_vm0, %v305_v58, 0.0  ;;  %v306_v62 = vmul.f32 %v1547_v57, %v1547_v57 }
 0x1ce   :  { %318 = vadd.xlane.f32.xlu1 %v317_v61  ;;  %v1186_v63 = vpop.f32.mrb[4].mxu1  ;;  %v311_v0 = vsel %vm108_vm0, %v303_v60, 0.0  ;;  %v304_v1 = vmul.f32 %v1551_v59, %v1551_v59 }
 0x1cf   :  { %v289_v2 = vadd.f32 %v1186_v63, %v1066_v46  ;;  %v280_v3 = vpop.f32.mrb[5].mxu1  ;;  %312 = vadd.xlane.f32.xlu0 %v311_v0  ;;  %v320_v9 = vsel %vm108_vm0, %v306_v62, 0.0  ;;  %v1304_v63 = vld [vmem:[%s1832_s8] sm:$0xff]  }
 0x1d0   :  { %v281_v4 = vadd.f32 %v1066_v46, %v280_v3  ;;  %v1187_v5 = vpop.f32.mrb[6].mxu1  ;;  %v314_v13 = vsel %vm108_vm0, %v304_v1, 0.0  ;;  %1222 = vmatprep.subr.bf16.mxu0 %v1304_v63 }
 0x1d1   :  { %v292_v7 = vadd.f32 %v1187_v5, %v1066_v46  ;;  %v283_v8 = vpop.f32.mrb[7].mxu1  ;;  %v1562_v10 = vmax.f32 %v289_v2, 0.0  ;;  %1223 = vmatpush3.bf16.msra.mxu0 %v1304_v63  ;;  %v1305_v5 = vld [vmem:[%s1832_s8 + $0x8] sm:$0xff]  }
 0x1d2   :  { %v1564_v11 = vmax.f32 %v281_v4, 0.0  ;;  %v284_v12 = vadd.f32 %v1066_v46, %v283_v8  ;;  %321 = vadd.xlane.f32.xlu1 %v320_v9  ;;  %1224 = vmatprep.subr.bf16.mxu0 %v1305_v5 }
 0x1d3   :  { %315 = vadd.xlane.f32.xlu0 %v314_v13  ;;  %v1567_v14 = vmax.f32 %v292_v7, 0.0  ;;  %v309_v20 = vmul.f32 %v1562_v10, %v1562_v10 }
 0x1d4   :  { %v1569_v15 = vmax.f32 %v284_v12, 0.0  ;;  %v307_v16 = vmul.f32 %v1564_v11, %v1564_v11 }
 0x1d5   :  { %v310_v23 = vmul.f32 %v1567_v14, %v1567_v14  ;;  %v329_v28 = vsel %vm108_vm0, %v309_v20, 0.0  ;;  %1225 = vmatpush3.bf16.msra.mxu0 %v1305_v5 }
 0x1d6   :  { %v323_v17 = vsel %vm108_vm0, %v307_v16, 0.0  ;;  %v308_v19 = vmul.f32 %v1569_v15, %v1569_v15  ;;  %1250 = vmatprep.subr.bf16.mxu0 %v1364_v6 }
 0x1d7   :  { %324 = vadd.xlane.f32.xlu0 %v323_v17  ;;  %v332_v33 = vsel %vm108_vm0, %v310_v23, 0.0 }
 0x1d8   :  { %v525_v21 = vpop.f32.mrb[8].mxu1  ;;  %v326_v22 = vsel %vm108_vm0, %v308_v19, 0.0 }
 0x1d9   :  { %v526_v24 = vadd.f32 %v1083_v18, %v525_v21  ;;  %v1212_v25 = vpop.f32.mrb[9].mxu1  ;;  %327 = vadd.xlane.f32.xlu1 %v326_v22 }
 0x1da   :  { %v528_v26 = vpop.f32.mrb[10].mxu1 }
 0x1db   :  { %v1585_v29 = vmax.f32 %v526_v24, 0.0  ;;  %v529_v30 = vadd.f32 %v1083_v18, %v528_v26  ;;  %330 = vadd.xlane.f32.xlu0 %v329_v28  ;;  %v1213_v32 = vpop.f32.mrb[11].mxu1 }
 0x1dd   :  { %v1588_v35 = vmax.f32 %v529_v30, 0.0  ;;  %333 = vadd.xlane.f32.xlu1 %v332_v33  ;;  %v554_v36 = vmul.f32 %v1585_v29, %v1585_v29 }
 0x1df   :  { %v560_v37 = vsel %vm108_vm0, %v554_v36, 0.0  ;;  %v555_v38 = vmul.f32 %v1588_v35, %v1588_v35 }
 0x1e0   :  { %v533_v39 = vpop.f32.mrb[12].mxu1  ;;  %561 = vadd.xlane.f32.xlu0 %v560_v37 }
 0x1e1   :  { %v534_v40 = vadd.f32 %v1083_v18, %v533_v39  ;;  %v1216_v41 = vpop.f32.mrb[13].mxu1  ;;  %v563_v42 = vsel %vm108_vm0, %v555_v38, 0.0 }
 0x1e2   :  { %v536_v46 = vpop.f32.mrb[14].mxu1  ;;  %564 = vadd.xlane.f32.xlu1 %v563_v42 }
 0x1e3   :  { %v1596_v47 = vmax.f32 %v534_v40, 0.0  ;;  %v537_v48 = vadd.f32 %v1083_v18, %v536_v46  ;;  %v1217_v49 = vpop.f32.mrb[15].mxu1 }
 0x1e5   :  { %v1598_v50 = vmax.f32 %v537_v48, 0.0  ;;  %v556_v51 = vmul.f32 %v1596_v47, %v1596_v47 }
 0x1e7   :  { %v566_v53 = vsel %vm108_vm0, %v556_v51, 0.0  ;;  %v557_v54 = vmul.f32 %v1598_v50, %v1598_v50 }
 0x1e8   :  { %v541_v56 = vpop.f32.mrb[16].mxu1  ;;  %567 = vadd.xlane.f32.xlu0 %v566_v53 }
 0x1e9   :  { %v542_v58 = vadd.f32 %v1083_v18, %v541_v56  ;;  %v1220_v60 = vpop.f32.mrb[17].mxu1  ;;  %v569_v61 = vsel %vm108_vm0, %v557_v54, 0.0  ;;  %v1306_v54 = vld [vmem:[%s1833_s10] sm:$0xff]  }
 0x1ea   :  { %v544_v62 = vpop.f32.mrb[18].mxu1  ;;  %570 = vadd.xlane.f32.xlu1 %v569_v61 }
 0x1eb   :  { %v1609_v0 = vmax.f32 %v542_v58, 0.0  ;;  %v545_v1 = vadd.f32 %v1083_v18, %v544_v62  ;;  %v1221_v2 = vpop.f32.mrb[19].mxu1 }
 0x1ed   :  { %v1611_v3 = vmax.f32 %v545_v1, 0.0  ;;  %v558_v4 = vmul.f32 %v1609_v0, %v1609_v0 }
 0x1ef   :  { %v572_v7 = vsel %vm108_vm0, %v558_v4, 0.0  ;;  %v559_v8 = vmul.f32 %v1611_v3, %v1611_v3 }
 0x1f0   :  { %573 = vadd.xlane.f32.xlu0 %v572_v7 }
 0x1f1   :  { %v575_v9 = vsel %vm108_vm0, %v559_v8, 0.0 }
 0x1f2   :  { %576 = vadd.xlane.f32.xlu1 %v575_v9 }
 0x25b   :  { %v319_v12 = vpop.xlane.xlu1 %318 }
 0x25c   :  { %v337_v13 = vmax.f32 %v319_v12, 1e-24  ;;  %v313_v16 = vpop.xlane.xlu0 %312 }
 0x25d   :  { %v335_v17 = vmax.f32 %v313_v16, 1e-24 }
 0x25e   :  { %1308 = vrsqrt.f32 %v337_v13 }
 0x25f   :  { %v322_v18 = vpop.xlane.xlu1 %321  ;;  %1310 = vrsqrt.f32 %v335_v17 }
 0x260   :  { %v338_v19 = vmax.f32 %v322_v18, 1e-24  ;;  %v316_v20 = vpop.xlane.xlu0 %315 }
 0x261   :  { %v336_v21 = vmax.f32 %v316_v20, 1e-24 }
 0x262   :  { %1312 = vrsqrt.f32 %v338_v19 }
 0x263   :  { %1314 = vrsqrt.f32 %v336_v21 }
 0x264   :  { %v325_v22 = vpop.xlane.xlu0 %324 }
 0x265   :  { %v339_v23 = vmax.f32 %v325_v22, 1e-24 }
 0x266   :  { %v328_v24 = vpop.xlane.xlu1 %327 }
 0x267   :  { %1316 = vrsqrt.f32 %v339_v23  ;;  %v340_v25 = vmax.f32 %v328_v24, 1e-24 }
 0x268   :  { %v331_v26 = vpop.xlane.xlu0 %330  ;;  %v1309_v30 = vpop.eup %1308 }
 0x269   :  { %1318 = vrsqrt.f32 %v340_v25  ;;  %v341_v28 = vmax.f32 %v331_v26, 1e-24  ;;  %v1311_v33 = vpop.eup %1310  ;;  %v353_v46 = vmul.f32 %v1309_v30, %v1543_v52 }
 0x26a   :  { %v334_v32 = vpop.xlane.xlu1 %333  ;;  %v351_v41 = vmul.f32 %v1311_v33, %v1545_v55 }
 0x26b   :  { %1320 = vrsqrt.f32 %v341_v28  ;;  %v342_v36 = vmax.f32 %v334_v32, 1e-24 }
 0x26c   :  { %v1313_v37 = vpop.eup %1312 }
 0x26d   :  { %v1315_v38 = vpop.eup %1314  ;;  %v354_v39 = vmul.f32 %v1313_v37, %v1547_v57  ;;  %1322 = vrsqrt.f32 %v342_v36  ;;  %v562_v40 = vpop.xlane.xlu0 %561 }
 0x26e   :  { %v352_v42 = vmul.f32 %v1315_v38, %v1551_v59  ;;  %v578_v48 = vmax.f32 %v562_v40, 1e-24  ;;  %v1307_v59 = vld [vmem:[%s1833_s10 + $0x8] sm:$0xff]  }
 0x26f   :  { %v565_v49 = vpop.xlane.xlu1 %564  ;;  %v597_v58 = vpack.c.bf16 %v354_v39, %v353_v46 }
 0x270   :  { %v579_v51 = vmax.f32 %v565_v49, 1e-24  ;;  %v596_v53 = vpack.c.bf16 %v352_v42, %v351_v41 }
 0x271   :  { %v1317_v56 = vpop.eup %1316 }
 0x272   :  { %1324 = vrsqrt.f32 %v579_v51  ;;  %1226 = vmatprep.mubr.msk.bf16.mxu0 %vm108_vm0, %v596_v53  ;;  %v355_v55 = vmul.f32 %v1317_v56, %v1564_v11 }
 0x273   :  { %v1319_v57 = vpop.eup %1318  ;;  %1326 = vrsqrt.f32 %v578_v48  ;;  %1227 = vmatmul.mubr.msk.bf16.vlgmr.msra.gmra.mrb[20].mxu0 %vm108_vm0, %v597_v58 }
 0x274   :  { %v356_v52 = vmul.f32 %v1319_v57, %v1569_v15  ;;  %1251 = vmatpush3.bf16.msra.mxu0 %v1306_v54 }
 0x275   :  { %v1321_v60 = vpop.eup %1320  ;;  %v568_v61 = vpop.xlane.xlu0 %567  ;;  %1252 = vmatprep.subr.bf16.mxu0 %v1364_v6 }
 0x276   :  { %v598_v62 = vpack.c.bf16 %v356_v52, %v355_v55  ;;  %v580_v1 = vmax.f32 %v568_v61, 1e-24  ;;  %v357_v11 = vmul.f32 %v1321_v60, %v1562_v10 }
 0x277   :  { %v1323_v63 = vpop.eup %1322  ;;  %v571_v2 = vpop.xlane.xlu1 %570 }
 0x278   :  { %v581_v4 = vmax.f32 %v571_v2, 1e-24  ;;  %1230 = vmatprep.mubr.msk.bf16.mxu0 %vm108_vm0, %v598_v62  ;;  %v358_v15 = vmul.f32 %v1323_v63, %v1567_v14  ;;  %1253 = vmatpush3.bf16.msra.mxu0 %v1307_v59 }
 0x27a   :  { %1328 = vrsqrt.f32 %v581_v4  ;;  %v599_v5 = vpack.c.bf16 %v358_v15, %v357_v11 }
 0x27b   :  { %1330 = vrsqrt.f32 %v580_v1 }
 0x27c   :  { %v1325_v7 = vpop.eup %1324  ;;  %1231 = vmatmul.mubr.msk.bf16.gmra.mrb[24].mxu0 %vm108_vm0, %v599_v5 }
 0x27d   :  { %v1327_v8 = vpop.eup %1326  ;;  %v574_v9 = vpop.xlane.xlu0 %573  ;;  %1254 = vmatprep.mubr.msk.bf16.mxu0 %vm1365_vm1, %v1364_v6  ;;  %v591_v12 = vmul.f32 %v1325_v7, %v1588_v35 }
 0x27e   :  { %v582_v13 = vmax.f32 %v574_v9, 1e-24  ;;  %v590_v10 = vmul.f32 %v1327_v8, %v1585_v29 }
 0x27f   :  { %v577_v16 = vpop.xlane.xlu1 %576 }
 0x280   :  { %v583_v17 = vmax.f32 %v577_v16, 1e-24  ;;  %v834_v14 = vpack.c.bf16 %v591_v12, %v590_v10 }
 0x282   :  { %1332 = vrsqrt.f32 %v583_v17 }
 0x283   :  { %1334 = vrsqrt.f32 %v582_v13 }
 0x284   :  { %v1329_v18 = vpop.eup %1328  ;;  %1255 = vmatmul.mubr.msk.bf16.vlgmr.msra.gmra.mrb[28].mxu0 %vm108_vm0, %v834_v14 }
 0x285   :  { %v1331_v19 = vpop.eup %1330  ;;  %1258 = vmatprep.mubr.msk.bf16.mxu0 %vm1365_vm1, %v1364_v6  ;;  %v593_v20 = vmul.f32 %v1329_v18, %v1598_v50 }
 0x286   :  { %v592_v21 = vmul.f32 %v1331_v19, %v1596_v47 }
 0x288   :  { %v835_v35 = vpack.c.bf16 %v593_v20, %v592_v21 }
 0x28c   :  { %v1333_v22 = vpop.eup %1332  ;;  %1259 = vmatmul.mubr.msk.bf16.gmra.mrb[32].mxu0 %vm108_vm0, %v835_v35 }
 0x28d   :  { %v1335_v29 = vpop.eup %1334  ;;  %1262 = vmatprep.mubr.msk.bf16.mxu0 %vm1365_vm1, %v1364_v6  ;;  %v595_v23 = vmul.f32 %v1333_v22, %v1611_v3 }
 0x28e   :  { %v594_v24 = vmul.f32 %v1335_v29, %v1609_v0 }
 0x290   :  { %v836_v25 = vpack.c.bf16 %v595_v23, %v594_v24 }
 0x294   :  { %1263 = vmatmul.mubr.msk.bf16.gmra.mrb[36].mxu0 %vm108_vm0, %v836_v25 }
 0x346   :  { %v1228_v26 = vpop.f32.mrb[20].mxu0 }
 0x347   :  { %v662_v28 = vpop.f32.mrb[21].mxu0 }
 0x348   :  { %v1229_v50 = vpop.f32.mrb[22].mxu0 }
 0x349   :  { %v694_v30 = vpack.c.bf16 %v1229_v50, %v1228_v26  ;;  %v665_v47 = vpop.f32.mrb[23].mxu0  ;;  %v1106_v26 = vld [vmem:[%s1835_s11] ss:$0 sm:$0xff] }
 0x34a   :  { %v693_v32 = vpack.c.bf16 %v665_v47, %v662_v28 }
 0x34c   :  { %1234 = vmatprep.subr.bf16.mxu1 %v693_v32 }
 0x34d   :  { %1235 = vmatpush3.bf16.msra.mxu1 %v693_v32 }
 0x34e   :  { %1236 = vmatprep.subr.bf16.mxu1 %v694_v30 }
 0x34f   :  { %v1232_v33 = vpop.f32.mrb[24].mxu0 }
 0x350   :  { %v678_v36 = vpop.f32.mrb[25].mxu0 }
 0x351   :  { %v1233_v37 = vpop.f32.mrb[26].mxu0  ;;  %1237 = vmatpush3.bf16.msra.mxu1 %v694_v30 }
 0x352   :  { %v696_v38 = vpack.c.bf16 %v1233_v37, %v1232_v33  ;;  %v681_v3 = vpop.f32.mrb[27].mxu0 }
 0x353   :  { %v695_v39 = vpack.c.bf16 %v681_v3, %v678_v36 }
 0x355   :  { %1238 = vmatprep.subr.bf16.mxu1 %v695_v39 }
 0x356   :  { %1239 = vmatpush3.bf16.msra.mxu1 %v695_v39 }
 0x357   :  { %1240 = vmatprep.subr.bf16.mxu1 %v696_v38  ;;  %v896_v0 = vpop.f32.mrb[28].mxu0 }
 0x358   :  { %v1256_v40 = vpop.f32.mrb[29].mxu0 }
 0x359   :  { %v899_v41 = vpop.f32.mrb[30].mxu0 }
 0x35a   :  { %v919_v42 = vpack.c.bf16 %v899_v41, %v896_v0  ;;  %1241 = vmatpush3.bf16.msra.mxu1 %v696_v38  ;;  %v1257_v46 = vpop.f32.mrb[31].mxu0 }
 0x35b   :  { %1266 = vmatprep.subr.bf16.mxu1 %v1364_v6 }
 0x35d   :  { %1243 = vmatmul.mubr.msk.bf16.vlgmr.msra.gmra.mrb[20].mxu1 %vm217_vm2, %v1491_v27 }
 0x35e   :  { %1267 = vmatpush3.bf16.msra.mxu1 %v919_v42  ;;  %1246 = vmatprep.mubr.msk.bf16.mxu1 %vm217_vm2, %v1496_v31 }
 0x35f   :  { %v904_v48 = vpop.f32.mrb[32].mxu0  ;;  %1268 = vmatprep.subr.bf16.mxu1 %v1364_v6 }
 0x360   :  { %v1260_v49 = vpop.f32.mrb[33].mxu0 }
 0x361   :  { %v907_v51 = vpop.f32.mrb[34].mxu0 }
 0x362   :  { %v920_v53 = vpack.c.bf16 %v907_v51, %v904_v48  ;;  %v1261_v54 = vpop.f32.mrb[35].mxu0 }
 0x364   :  { %1269 = vmatpush3.bf16.msra.mxu1 %v920_v53 }
 0x365   :  { %1247 = vmatmul.mubr.msk.bf16.gmra.mrb[24].mxu1 %vm217_vm2, %v1507_v34  ;;  %1270 = vmatprep.subr.bf16.mxu1 %v1364_v6  ;;  %v1096_v34 = vld [vmem:[%s1834_s9] ss:$0 sm:$0xff] }
 0x366   :  { %1272 = vmatprep.mubr.msk.bf16.mxu1 %vm1365_vm1, %v1364_v6 }
 0x367   :  { %v912_v27 = vpop.f32.mrb[36].mxu0 }
 0x368   :  { %v1264_v56 = vpop.f32.mrb[37].mxu0 }
 0x369   :  { %v915_v58 = vpop.f32.mrb[38].mxu0 }
 0x36a   :  { %v921_v31 = vpack.c.bf16 %v915_v58, %v912_v27  ;;  %v1265_v57 = vpop.f32.mrb[39].mxu0 }
 0x36c   :  { %1271 = vmatpush3.bf16.msra.mxu1 %v921_v31 }
 0x36f   :  { %1273 = vmatmul.mubr.msk.bf16.vlgmr.msra.gmra.mrb[28].mxu1 %vm481_vm3, %v1517_v43 }
 0x370   :  { %1276 = vmatprep.mubr.msk.bf16.mxu1 %vm1365_vm1, %v1364_v6 }
 0x377   :  { %1277 = vmatmul.mubr.msk.bf16.gmra.mrb[32].mxu1 %vm481_vm3, %v1526_v44 }
 0x378   :  { %1280 = vmatprep.mubr.msk.bf16.mxu1 %vm1365_vm1, %v1364_v6 }
 0x37f   :  { %1281 = vmatmul.mubr.msk.bf16.gmra.mrb[36].mxu1 %vm481_vm3, %v1535_v45 }
 0x430   :  { %v1244_v55 = vpop.f32.mrb[20].mxu1 }
 0x431   :  { %v747_v52 = vadd.f32 %v1244_v55, %v1096_v34  ;;  %v738_v59 = vpop.f32.mrb[21].mxu1 }
 0x432   :  { %v739_v43 = vadd.f32 %v1096_v34, %v738_v59  ;;  %v1245_v60 = vpop.f32.mrb[22].mxu1 }
 0x433   :  { %v1681_v61 = vmax.f32 %v747_v52, 0.0  ;;  %v750_v62 = vadd.f32 %v1245_v60, %v1096_v34  ;;  %v741_v63 = vpop.f32.mrb[23].mxu1 }
 0x434   :  { %v1683_v44 = vmax.f32 %v739_v43, 0.0  ;;  %v742_v1 = vadd.f32 %v1096_v34, %v741_v63 }
 0x435   :  { %v1685_v6 = vmax.f32 %v750_v62, 0.0  ;;  %v779_v45 = vmul.f32 %v1681_v61, %v1681_v61 }
 0x436   :  { %v1689_v2 = vmax.f32 %v742_v1, 0.0  ;;  %v777_v15 = vmul.f32 %v1683_v44, %v1683_v44 }
 0x437   :  { %v792_v4 = vsel %vm785_vm4, %v779_v45, 0.0  ;;  %v780_v11 = vmul.f32 %v1685_v6, %v1685_v6 }
 0x438   :  { %793 = vadd.xlane.f32.xlu0 %v792_v4  ;;  %v1248_v5 = vpop.f32.mrb[24].mxu1  ;;  %v778_v12 = vmul.f32 %v1689_v2, %v1689_v2  ;;  %v786_v14 = vsel %vm785_vm4, %v777_v15, 0.0 }
 0x439   :  { %v763_v7 = vadd.f32 %v1248_v5, %v1096_v34  ;;  %v754_v8 = vpop.f32.mrb[25].mxu1  ;;  %v795_v9 = vsel %vm785_vm4, %v780_v11, 0.0 }
 0x43a   :  { %v755_v13 = vadd.f32 %v1096_v34, %v754_v8  ;;  %796 = vadd.xlane.f32.xlu1 %v795_v9  ;;  %v1249_v16 = vpop.f32.mrb[26].mxu1  ;;  %v789_v35 = vsel %vm785_vm4, %v778_v12, 0.0 }
 0x43b   :  { %v1699_v10 = vmax.f32 %v763_v7, 0.0  ;;  %v766_v17 = vadd.f32 %v1249_v16, %v1096_v34  ;;  %v757_v18 = vpop.f32.mrb[27].mxu1 }
 0x43c   :  { %v1702_v19 = vmax.f32 %v755_v13, 0.0  ;;  %787 = vadd.xlane.f32.xlu0 %v786_v14  ;;  %v758_v20 = vadd.f32 %v1096_v34, %v757_v18 }
 0x43d   :  { %v1704_v21 = vmax.f32 %v766_v17, 0.0  ;;  %v783_v22 = vmul.f32 %v1699_v10, %v1699_v10 }
 0x43e   :  { %v1709_v29 = vmax.f32 %v758_v20, 0.0  ;;  %790 = vadd.xlane.f32.xlu1 %v789_v35  ;;  %v781_v25 = vmul.f32 %v1702_v19, %v1702_v19 }
 0x43f   :  { %v804_v23 = vsel %vm785_vm4, %v783_v22, 0.0  ;;  %v784_v24 = vmul.f32 %v1704_v21, %v1704_v21 }
 0x440   :  { %805 = vadd.xlane.f32.xlu0 %v804_v23  ;;  %v782_v50 = vmul.f32 %v1709_v29, %v1709_v29  ;;  %v798_v33 = vsel %vm785_vm4, %v781_v25, 0.0 }
 0x441   :  { %v807_v28 = vsel %vm785_vm4, %v784_v24, 0.0 }
 0x442   :  { %808 = vadd.xlane.f32.xlu1 %v807_v28  ;;  %v963_v30 = vpop.f32.mrb[28].mxu1  ;;  %v801_v3 = vsel %vm785_vm4, %v782_v50, 0.0 }
 0x443   :  { %v964_v47 = vadd.f32 %v1106_v26, %v963_v30  ;;  %v1274_v32 = vpop.f32.mrb[29].mxu1 }
 0x444   :  { %799 = vadd.xlane.f32.xlu0 %v798_v33  ;;  %v966_v36 = vpop.f32.mrb[30].mxu1 }
 0x445   :  { %v1723_v37 = vmax.f32 %v964_v47, 0.0  ;;  %v967_v38 = vadd.f32 %v1106_v26, %v966_v36  ;;  %v1275_v39 = vpop.f32.mrb[31].mxu1 }
 0x446   :  { %802 = vadd.xlane.f32.xlu1 %v801_v3 }
 0x447   :  { %v1726_v0 = vmax.f32 %v967_v38, 0.0  ;;  %v992_v40 = vmul.f32 %v1723_v37, %v1723_v37 }
 0x449   :  { %v998_v41 = vsel %vm785_vm4, %v992_v40, 0.0  ;;  %v993_v42 = vmul.f32 %v1726_v0, %v1726_v0 }
 0x44a   :  { %999 = vadd.xlane.f32.xlu0 %v998_v41  ;;  %v971_v46 = vpop.f32.mrb[32].mxu1 }
 0x44b   :  { %v972_v48 = vadd.f32 %v1106_v26, %v971_v46  ;;  %v1278_v49 = vpop.f32.mrb[33].mxu1  ;;  %v1001_v51 = vsel %vm785_vm4, %v993_v42, 0.0 }
 0x44c   :  { %1002 = vadd.xlane.f32.xlu1 %v1001_v51  ;;  %v974_v53 = vpop.f32.mrb[34].mxu1 }
 0x44d   :  { %v1734_v54 = vmax.f32 %v972_v48, 0.0  ;;  %v975_v27 = vadd.f32 %v1106_v26, %v974_v53  ;;  %v1279_v56 = vpop.f32.mrb[35].mxu1 }
 0x44f   :  { %v1736_v58 = vmax.f32 %v975_v27, 0.0  ;;  %v994_v31 = vmul.f32 %v1734_v54, %v1734_v54 }
 0x451   :  { %v1004_v57 = vsel %vm785_vm4, %v994_v31, 0.0  ;;  %v995_v34 = vmul.f32 %v1736_v58, %v1736_v58 }
 0x452   :  { %1005 = vadd.xlane.f32.xlu0 %v1004_v57  ;;  %v979_v55 = vpop.f32.mrb[36].mxu1 }
 0x453   :  { %v980_v52 = vadd.f32 %v1106_v26, %v979_v55  ;;  %v1282_v59 = vpop.f32.mrb[37].mxu1  ;;  %v1007_v43 = vsel %vm785_vm4, %v995_v34, 0.0 }
 0x454   :  { %1008 = vadd.xlane.f32.xlu1 %v1007_v43  ;;  %v982_v60 = vpop.f32.mrb[38].mxu1 }
 0x455   :  { %v1744_v62 = vmax.f32 %v980_v52, 0.0  ;;  %v983_v63 = vadd.f32 %v1106_v26, %v982_v60  ;;  %v1283_v1 = vpop.f32.mrb[39].mxu1 }
 0x457   :  { %v1746_v45 = vmax.f32 %v983_v63, 0.0  ;;  %v996_v4 = vmul.f32 %v1744_v62, %v1744_v62 }
 0x459   :  { %v1010_v11 = vsel %vm785_vm4, %v996_v4, 0.0  ;;  %v997_v15 = vmul.f32 %v1746_v45, %v1746_v45 }
 0x45a   :  { %1011 = vadd.xlane.f32.xlu0 %v1010_v11 }
 0x45b   :  { %v1013_v5 = vsel %vm785_vm4, %v997_v15, 0.0 }
 0x45c   :  { %1014 = vadd.xlane.f32.xlu1 %v1013_v5 }
 0x4c5   :  { %v794_v7 = vpop.xlane.xlu0 %793 }
 0x4c6   :  { %v812_v8 = vmax.f32 %v794_v7, 1e-24 }
 0x4c7   :  { %v797_v9 = vpop.xlane.xlu1 %796 }
 0x4c8   :  { %1336 = vrsqrt.f32 %v812_v8  ;;  %v813_v12 = vmax.f32 %v797_v9, 1e-24 }
 0x4c9   :  { %v788_v13 = vpop.xlane.xlu0 %787 }
 0x4ca   :  { %1338 = vrsqrt.f32 %v813_v12  ;;  %v810_v16 = vmax.f32 %v788_v13, 1e-24 }
 0x4cb   :  { %v791_v17 = vpop.xlane.xlu1 %790 }
 0x4cc   :  { %1340 = vrsqrt.f32 %v810_v16  ;;  %v811_v14 = vmax.f32 %v791_v17, 1e-24 }
 0x4cd   :  { %v806_v18 = vpop.xlane.xlu0 %805 }
 0x4ce   :  { %1342 = vrsqrt.f32 %v811_v14  ;;  %v816_v20 = vmax.f32 %v806_v18, 1e-24 }
 0x4cf   :  { %v809_v35 = vpop.xlane.xlu1 %808 }
 0x4d0   :  { %1344 = vrsqrt.f32 %v816_v20  ;;  %v817_v22 = vmax.f32 %v809_v35, 1e-24 }
 0x4d1   :  { %v800_v23 = vpop.xlane.xlu0 %799 }
 0x4d2   :  { %v1337_v24 = vpop.eup %1336  ;;  %1346 = vrsqrt.f32 %v817_v22  ;;  %v814_v25 = vmax.f32 %v800_v23, 1e-24 }
 0x4d3   :  { %v828_v26 = vmul.f32 %v1337_v24, %v1681_v61  ;;  %v803_v28 = vpop.xlane.xlu1 %802 }
 0x4d4   :  { %v1339_v50 = vpop.eup %1338  ;;  %1348 = vrsqrt.f32 %v814_v25  ;;  %v815_v30 = vmax.f32 %v803_v28, 1e-24 }
 0x4d5   :  { %1036 = vst.msk [vmem:[%s1836_s12 + $0x10] sm:$0xff] %vm785_vm4, %v828_v26  ;;  %v829_v47 = vmul.f32 %v1339_v50, %v1685_v6 }
 0x4d6   :  { %v1341_v32 = vpop.eup %1340  ;;  %1350 = vrsqrt.f32 %v815_v30 }
 0x4d7   :  { %1037 = vst.msk [vmem:[%s1836_s12 + $0x18] sm:$0xff] %vm785_vm4, %v829_v47  ;;  %v826_v61 = vmul.f32 %v1341_v32, %v1683_v44  ;;  %v1000_v33 = vpop.xlane.xlu0 %999 }
 0x4d8   :  { %v1343_v36 = vpop.eup %1342  ;;  %v1016_v38 = vmax.f32 %v1000_v33, 1e-24 }
 0x4d9   :  { %1034 = vst.msk [vmem:[%s1836_s12] sm:$0xff] %vm785_vm4, %v826_v61  ;;  %v827_v3 = vmul.f32 %v1343_v36, %v1689_v2  ;;  %v1003_v6 = vpop.xlane.xlu1 %1002 }
 0x4da   :  { %v1345_v39 = vpop.eup %1344  ;;  %1352 = vrsqrt.f32 %v1016_v38  ;;  %v1017_v40 = vmax.f32 %v1003_v6, 1e-24 }
 0x4db   :  { %1035 = vst.msk [vmem:[%s1836_s12 + $0x8] sm:$0xff] %vm785_vm4, %v827_v3  ;;  %v832_v44 = vmul.f32 %v1345_v39, %v1699_v10 }
 0x4dc   :  { %v1347_v41 = vpop.eup %1346  ;;  %1354 = vrsqrt.f32 %v1017_v40 }
 0x4dd   :  { %1040 = vst.msk [vmem:[%s1836_s12 + $0x30] sm:$0xff] %vm785_vm4, %v832_v44  ;;  %v833_v2 = vmul.f32 %v1347_v41, %v1704_v21 }
 0x4de   :  { %v1349_v42 = vpop.eup %1348 }
 0x4df   :  { %1041 = vst.msk [vmem:[%s1836_s12 + $0x38] sm:$0xff] %vm785_vm4, %v833_v2  ;;  %v830_v46 = vmul.f32 %v1349_v42, %v1702_v19  ;;  %v1006_v48 = vpop.xlane.xlu0 %1005 }
 0x4e0   :  { %v1351_v49 = vpop.eup %1350  ;;  %v1018_v10 = vmax.f32 %v1006_v48, 1e-24 }
 0x4e1   :  { %1038 = vst.msk [vmem:[%s1836_s12 + $0x20] sm:$0xff] %vm785_vm4, %v830_v46  ;;  %v831_v51 = vmul.f32 %v1351_v49, %v1709_v29  ;;  %v1009_v53 = vpop.xlane.xlu1 %1008 }
 0x4e2   :  { %1356 = vrsqrt.f32 %v1018_v10  ;;  %v1019_v21 = vmax.f32 %v1009_v53, 1e-24 }
 0x4e3   :  { %1039 = vst.msk [vmem:[%s1836_s12 + $0x28] sm:$0xff] %vm785_vm4, %v831_v51 }
 0x4e4   :  { %v1353_v27 = vpop.eup %1352  ;;  %1358 = vrsqrt.f32 %v1019_v21 }
 0x4e5   :  { %v1028_v19 = vmul.f32 %v1353_v27, %v1723_v37 }
 0x4e6   :  { %v1355_v56 = vpop.eup %1354 }
 0x4e7   :  { %1042 = vst.msk [vmem:[%s1837_s13] sm:$0xff] %vm785_vm4, %v1028_v19  ;;  %v1029_v29 = vmul.f32 %v1355_v56, %v1726_v0  ;;  %v1012_v31 = vpop.xlane.xlu0 %1011 }
 0x4e8   :  { %v1020_v57 = vmax.f32 %v1012_v31, 1e-24 }
 0x4e9   :  { %1043 = vst.msk [vmem:[%s1837_s13 + $0x8] sm:$0xff] %vm785_vm4, %v1029_v29  ;;  %v1015_v34 = vpop.xlane.xlu1 %1014 }
 0x4ea   :  { %1360 = vrsqrt.f32 %v1020_v57  ;;  %v1021_v55 = vmax.f32 %v1015_v34, 1e-24 }
 0x4ec   :  { %v1357_v52 = vpop.eup %1356  ;;  %1362 = vrsqrt.f32 %v1021_v55 }
 0x4ed   :  { %v1030_v37 = vmul.f32 %v1357_v52, %v1734_v54 }
 0x4ee   :  { %v1359_v59 = vpop.eup %1358 }
 0x4ef   :  { %1044 = vst.msk [vmem:[%s1837_s13 + $0x10] sm:$0xff] %vm785_vm4, %v1030_v37  ;;  %v1031_v0 = vmul.f32 %v1359_v59, %v1736_v58 }
 0x4f1   :  { %1045 = vst.msk [vmem:[%s1837_s13 + $0x18] sm:$0xff] %vm785_vm4, %v1031_v0 }
 0x4f4   :  { %v1361_v43 = vpop.eup %1360 }
 0x4f5   :  { %v1032_v60 = vmul.f32 %v1361_v43, %v1744_v62 }
 0x4f6   :  { %v1363_v63 = vpop.eup %1362 }
 0x4f7   :  { %1046 = vst.msk [vmem:[%s1837_s13 + $0x20] sm:$0xff] %vm785_vm4, %v1032_v60  ;;  %v1033_v54 = vmul.f32 %v1363_v63, %v1746_v45 }
 0x4f9   :  { %1047 = vst.msk [vmem:[%s1837_s13 + $0x28] sm:$0xff] %vm785_vm4, %v1033_v54 }

</bundles_post_ra>
